<compile_context>
chip_gen: v7x
topology: tpu7x:2x2x1
jax: 0.10.0
libtpu: 0.0.40
codegen_flags: <defaults>
</compile_context>

<pallas_src>
import functools

import jax
import jax.numpy as jnp
from jax.experimental import pallas as pl
from jax.experimental.pallas import tpu as pltpu


def _round_up(x, m):
    return (x + m - 1) // m * m


def _pick_time_tile(T, K, cin_p, cout_p, p_r, vmem_bytes):
    """Pick a time tile (lane columns) that fits comfortably in this generation's VMEM."""
    per_col = (4 * cin_p            # x lead tile, bf16, double-buffered
               + 8 * cout_p         # f32 output tile, double-buffered
               + 2 * cin_p          # halo+tile concat copy
               + 2 * K * cin_p      # im2col tile (bf16)
               + 6 * cout_p         # conv activation h (f32 + bf16 copy)
               + 8 * cout_p         # fused GLU pre-activation (f32)
               + 16 * cout_p)       # glu / residual / sum temporaries
    budget = int(vmem_bytes * 0.4)  # leave headroom for weights + pipeliner
    tT = budget // max(per_col, 1)
    tT = (tT // p_r) * p_r
    cap = max(p_r, (8192 // p_r) * p_r)
    tT = max(p_r, min(tT, cap))
    tT = min(tT, _round_up(T, p_r))
    return tT


def temporal_block_kernel(xa_ref, xb_ref, wconv_ref, wglu_ref, bglu_ref, *rest,
                          K, dilation, P, P_r, use_downsample):
    if use_downsample:
        wd_ref, bd_ref, out_ref = rest
    else:
        (out_ref,) = rest

    xa = xa_ref[0]                       # (Cin_p, tT)  bf16 : x cols [t*tT - P_r, (t+1)*tT - P_r)
    xb = xb_ref[0]                       # (Cin_p, P_r) bf16 : x cols [(t+1)*tT - P_r, (t+1)*tT)
    tT = xa.shape[-1]
    cout_p = out_ref.shape[1]

    # contiguous causal window: xfull[:, j] = x[:, t*tT - P_r + j]
    xfull = jnp.concatenate([xa, xb], axis=-1)            # (Cin_p, P_r + tT)
    off = P_r - P

    # --- dilated causal conv as a single im2col matmul on the MXU ---
    # tap k at local time tau reads x[:, t*tT + tau - P + k*dilation]
    cols = [xfull[:, off + k * dilation: off + k * dilation + tT] for k in range(K)]
    xw = cols[K - 1]                                      # tap K-1 == un-shifted tile itself
    xcol = jnp.concatenate(cols, axis=0)                  # (K*Cin_p, tT) bf16
    h = jnp.dot(wconv_ref[...], xcol,
                preferred_element_type=jnp.float32)       # (Cout_p, tT) f32 (bias folded below)

    # --- GLU: both 1x1 convs fused into one (2*Cout_p, Cout_p) matmul; conv bias folded
    #     into bglu on the host ---
    g = jnp.dot(wglu_ref[...], h.astype(jnp.bfloat16),
                preferred_element_type=jnp.float32) + bglu_ref[...]   # (2*Cout_p, tT) f32
    glu = g[:cout_p, :] * jax.nn.sigmoid(g[cout_p:, :])

    # dropout1 is identity at inference time.

    # --- residual / downsample (1x1 conv) ---
    if use_downsample:
        res = jnp.dot(wd_ref[...], xw,
                      preferred_element_type=jnp.float32) + bd_ref[...]
    else:
        res = xw.astype(jnp.float32)      # Cin == Cout  =>  Cin_p == Cout_p

    out_ref[0] = (glu + res).astype(out_ref.dtype)


def temporal_block(x, params, kernel_size, dilation):
    """x: (B, Cin, T) float32, like the PyTorch module. Returns (B, Cout, T) float32."""
    B, Cin, T = x.shape
    K = kernel_size
    P = (K - 1) * dilation
    Cout = params["w_conv"].shape[0]
    use_downsample = Cin != Cout

    Cin_p = _round_up(Cin, 16)            # sublane (bf16 pack) granule only -- no 128 padding
    Cout_p = _round_up(Cout, 16)
    P_r = _round_up(max(P, 1), 128)       # halo width along lanes, 128-aligned

    try:
        vmem_bytes = int(pltpu.get_tpu_info().vmem_capacity_bytes)
    except Exception:
        vmem_bytes = 64 * 1024 * 1024     # conservative (v7x per-TC) fallback

    tT = _pick_time_tile(T, K, Cin_p, Cout_p, P_r, vmem_bytes)
    n_t = -(-T // tT)
    T_r = n_t * tT
    T_lp = T_r + tT                       # multiple of both tT and P_r

    # Native (B, C, T) layout kept end-to-end: one pad+cast, no transposes, no gather.
    # x_lp[:, :, j] = x[:, :, j - P_r]  (causal zeros on the left).
    x_lp = jnp.pad(x, ((0, 0), (0, Cin_p - Cin), (P_r, T_lp - P_r - T))).astype(jnp.bfloat16)

    # --- weights: left-multiplication layout, pad channels, cast to bf16 ---
    wc = jnp.transpose(params["w_conv"], (0, 2, 1))                    # (Cout, K, Cin)
    wc = jnp.pad(wc, ((0, Cout_p - Cout), (0, 0), (0, Cin_p - Cin)))
    w_conv = wc.reshape(Cout_p, K * Cin_p).astype(jnp.bfloat16)        # matches im2col rows

    def pad2(w, r, c):
        return jnp.pad(w, ((0, r - w.shape[0]), (0, c - w.shape[1])))

    wg_f32 = jnp.concatenate([pad2(params["w_glu1"][:, :, 0], Cout_p, Cout_p),
                              pad2(params["w_glu2"][:, :, 0], Cout_p, Cout_p)], axis=0)
    bc = jnp.pad(params["b_conv"], (0, Cout_p - Cout))
    bg = jnp.concatenate([jnp.pad(params["b_glu1"], (0, Cout_p - Cout)),
                          jnp.pad(params["b_glu2"], (0, Cout_p - Cout))])
    # fold conv bias into GLU bias: Wg @ (h + bc) + bg == Wg @ h + (Wg @ bc + bg)
    b_glu = (wg_f32 @ bc + bg).reshape(2 * Cout_p, 1).astype(jnp.float32)
    w_glu = wg_f32.astype(jnp.bfloat16)

    stride = tT // P_r
    inputs = [x_lp, x_lp, w_conv, w_glu, b_glu]
    in_specs = [
        # lead block: x_lp cols [t*tT, (t+1)*tT) == x cols [t*tT - P_r, (t+1)*tT - P_r)
        pl.BlockSpec((1, Cin_p, tT), lambda b, t: (b, 0, t)),
        # tail block: x_lp cols [(t+1)*tT, (t+1)*tT + P_r) == x cols [(t+1)*tT - P_r, (t+1)*tT)
        pl.BlockSpec((1, Cin_p, P_r), lambda b, t: (b, 0, (t + 1) * stride)),
        pl.BlockSpec((Cout_p, K * Cin_p), lambda b, t: (0, 0)),
        pl.BlockSpec((2 * Cout_p, Cout_p), lambda b, t: (0, 0)),
        pl.BlockSpec((2 * Cout_p, 1), lambda b, t: (0, 0)),
    ]
    if use_downsample:
        w_down = pad2(params["w_down"][:, :, 0], Cout_p, Cin_p).astype(jnp.bfloat16)
        b_down = jnp.pad(params["b_down"], (0, Cout_p - Cout)).reshape(Cout_p, 1).astype(jnp.float32)
        inputs += [w_down, b_down]
        in_specs += [pl.BlockSpec((Cout_p, Cin_p), lambda b, t: (0, 0)),
                     pl.BlockSpec((Cout_p, 1), lambda b, t: (0, 0))]

    kernel = functools.partial(temporal_block_kernel, K=K, dilation=dilation,
                               P=P, P_r=P_r, use_downsample=use_downsample)

    vmem_limit = max(32 << 20, min(vmem_bytes * 3 // 4, 100 << 20))

    out = pl.pallas_call(
        kernel,
        out_shape=jax.ShapeDtypeStruct((B, Cout_p, T_r), jnp.float32),
        grid=(B, n_t),
        in_specs=in_specs,
        out_specs=pl.BlockSpec((1, Cout_p, tT), lambda b, t: (b, 0, t)),
        compiler_params=pltpu.CompilerParams(
            dimension_semantics=("parallel", "parallel"),
            vmem_limit_bytes=vmem_limit),
    )(*inputs)

    return out[:, :Cout, :T]              # drop channel/time padding; already (B, Cout, T)


def temporal_block_reference(x, params, kernel_size, dilation):
    """Pure-JAX f32 reference (same math, different code path) for validation."""
    B, Cin, T = x.shape
    K = kernel_size
    P = (K - 1) * dilation
    Cout = params["w_conv"].shape[0]
    x_pad = jnp.pad(x, ((0, 0), (0, 0), (P, 0)))
    h = jnp.zeros((B, Cout, T), jnp.float32)
    for k in range(K):
        xs = x_pad[:, :, k * dilation: k * dilation + T]
        h = h + jnp.einsum("oc,bct->bot", params["w_conv"][:, :, k], xs)
    h = h + params["b_conv"][None, :, None]
    g1 = jnp.einsum("po,bot->bpt", params["w_glu1"][:, :, 0], h) + params["b_glu1"][None, :, None]
    g2 = jnp.einsum("po,bot->bpt", params["w_glu2"][:, :, 0], h) + params["b_glu2"][None, :, None]
    glu = g1 * jax.nn.sigmoid(g2)
    if Cin != Cout:
        res = jnp.einsum("oc,bct->bot", params["w_down"][:, :, 0], x) + params["b_down"][None, :, None]
    else:
        res = x
    return glu + res


def make_params(key, n_inputs, n_outputs, kernel_size):
    """Deterministic synthetic parameters (PyTorch shapes: Conv1d weight (Cout, Cin, K))."""
    ks = jax.random.split(key, 8)
    return {
        # init_weights(): normal(0, 0.01) for conv1 and downsample
        "w_conv": 0.01 * jax.random.normal(ks[0], (n_outputs, n_inputs, kernel_size), jnp.float32),
        "b_conv": 0.1 * jax.random.normal(ks[1], (n_outputs,), jnp.float32),
        "w_glu1": 0.2 * jax.random.normal(ks[2], (n_outputs, n_outputs, 1), jnp.float32),
        "b_glu1": 0.1 * jax.random.normal(ks[3], (n_outputs,), jnp.float32),
        "w_glu2": 0.2 * jax.random.normal(ks[4], (n_outputs, n_outputs, 1), jnp.float32),
        "b_glu2": 0.1 * jax.random.normal(ks[5], (n_outputs,), jnp.float32),
        "w_down": 0.01 * jax.random.normal(ks[6], (n_outputs, n_inputs, 1), jnp.float32),
        "b_down": 0.1 * jax.random.normal(ks[7], (n_outputs,), jnp.float32),
    }


if __name__ == "__main__":
    key = jax.random.PRNGKey(0)
    B, Cin, Cout, T = 2, 4, 8, 16
    kernel_size, dilation, dropout = 3, 2, 0.1  # dropout is identity at inference

    k_x, k_p = jax.random.split(key)
    x = jax.random.normal(k_x, (B, Cin, T), jnp.float32)
    params = make_params(k_p, Cin, Cout, kernel_size)

    out = temporal_block(x, params, kernel_size, dilation)
    out = jax.block_until_ready(out)

    ref = temporal_block_reference(x, params, kernel_size, dilation)
    assert out.shape == (B, Cout, T)
    # bf16 activations/weights inside the kernel -> loosened tolerance vs f32 reference
    assert jnp.allclose(out, ref, atol=2e-2, rtol=2e-2), "Pallas kernel mismatch vs reference"

    print("KERNEL_OK")
</pallas_src>

<mosaic_0001>
module attributes {stable_mosaic.version = 11 : i64} {
  func.func @temporal_block_kernel(%arg0: i32, %arg1: i32, %arg2: memref<1x16x128xbf16, #tpu.memory_space<vmem>>, %arg3: memref<1x16x128xbf16, #tpu.memory_space<vmem>>, %arg4: memref<16x48xbf16, #tpu.memory_space<vmem>>, %arg5: memref<32x16xbf16, #tpu.memory_space<vmem>>, %arg6: memref<32x1xf32, #tpu.memory_space<vmem>>, %arg7: memref<16x16xbf16, #tpu.memory_space<vmem>>, %arg8: memref<16x1xf32, #tpu.memory_space<vmem>>, %arg9: memref<1x16x128xf32, #tpu.memory_space<vmem>>) attributes {dimension_semantics = [#tpu.dimension_semantics<parallel>, #tpu.dimension_semantics<parallel>], iteration_bounds = array<i64: 2, 1>, scalar_prefetch = 0 : i64, scratch_operands = 0 : i64, tpu.core_type = #tpu.core_type<tc>, window_params = [{transform_indices = @transform_0, window_bounds = array<i64: 1, 16, 128>}, {transform_indices = @transform_1, window_bounds = array<i64: 1, 16, 128>}, {pipeline_mode = #tpu.pipeline_mode<synchronous>, transform_indices = @transform_2, window_bounds = array<i64: 16, 48>}, {pipeline_mode = #tpu.pipeline_mode<synchronous>, transform_indices = @transform_3, window_bounds = array<i64: 32, 16>}, {pipeline_mode = #tpu.pipeline_mode<synchronous>, transform_indices = @transform_4, window_bounds = array<i64: 32, 1>}, {pipeline_mode = #tpu.pipeline_mode<synchronous>, transform_indices = @transform_5, window_bounds = array<i64: 16, 16>}, {pipeline_mode = #tpu.pipeline_mode<synchronous>, transform_indices = @transform_6, window_bounds = array<i64: 16, 1>}, {transform_indices = @transform_7, window_bounds = array<i64: 1, 16, 128>}]} {
    %c0 = arith.constant 0 : index
    %c0_0 = arith.constant 0 : index
    %c0_1 = arith.constant 0 : index
    %0 = vector.load %arg2[%c0, %c0_0, %c0_1] : memref<1x16x128xbf16, #tpu.memory_space<vmem>>, vector<1x16x128xbf16>
    %1 = vector.shape_cast %0 : vector<1x16x128xbf16> to vector<16x128xbf16>
    %c0_2 = arith.constant 0 : index
    %c0_3 = arith.constant 0 : index
    %c0_4 = arith.constant 0 : index
    %2 = vector.load %arg3[%c0_2, %c0_3, %c0_4] : memref<1x16x128xbf16, #tpu.memory_space<vmem>>, vector<1x16x128xbf16>
    %3 = vector.shape_cast %2 : vector<1x16x128xbf16> to vector<16x128xbf16>
    %4 = tpu.concatenate %1, %3 in 1 : vector<16x128xbf16>, vector<16x128xbf16> -> vector<16x256xbf16>
    %5 = vector.extract_strided_slice %4 {offsets = [0, 124], sizes = [16, 128], strides = [1, 1]} : vector<16x256xbf16> to vector<16x128xbf16>
    %6 = vector.extract_strided_slice %4 {offsets = [0, 126], sizes = [16, 128], strides = [1, 1]} : vector<16x256xbf16> to vector<16x128xbf16>
    %7 = vector.extract_strided_slice %4 {offsets = [0, 128], sizes = [16, 128], strides = [1, 1]} : vector<16x256xbf16> to vector<16x128xbf16>
    %8 = tpu.concatenate %5, %6, %7 in 0 : vector<16x128xbf16>, vector<16x128xbf16>, vector<16x128xbf16> -> vector<48x128xbf16>
    %c0_5 = arith.constant 0 : index
    %c0_6 = arith.constant 0 : index
    %9 = vector.load %arg4[%c0_5, %c0_6] : memref<16x48xbf16, #tpu.memory_space<vmem>>, vector<16x48xbf16>
    %cst = arith.constant dense<0.000000e+00> : vector<16x128xf32>
    %10 = tpu.matmul %9, %8, %cst {dimension_numbers = #tpu.dot_dimension_numbers<[1], [0], [0], [1], [0, 0, 1, 1], [], []>} : vector<16x48xbf16>, vector<48x128xbf16>, vector<16x128xf32> -> vector<16x128xf32>
    %c0_7 = arith.constant 0 : index
    %c0_8 = arith.constant 0 : index
    %11 = vector.load %arg5[%c0_7, %c0_8] : memref<32x16xbf16, #tpu.memory_space<vmem>>, vector<32x16xbf16>
    %12 = arith.truncf %10 : vector<16x128xf32> to vector<16x128xbf16>
    %cst_9 = arith.constant dense<0.000000e+00> : vector<32x128xf32>
    %13 = tpu.matmul %11, %12, %cst_9 {dimension_numbers = #tpu.dot_dimension_numbers<[1], [0], [0], [1], [0, 0, 1, 1], [], []>} : vector<32x16xbf16>, vector<16x128xbf16>, vector<32x128xf32> -> vector<32x128xf32>
    %c0_10 = arith.constant 0 : index
    %c0_11 = arith.constant 0 : index
    %14 = vector.load %arg6[%c0_10, %c0_11] : memref<32x1xf32, #tpu.memory_space<vmem>>, vector<32x1xf32>
    %15 = vector.broadcast %14 : vector<32x1xf32> to vector<32x128xf32>
    %16 = arith.addf %13, %15 : vector<32x128xf32>
    %17 = vector.extract_strided_slice %16 {offsets = [0, 0], sizes = [16, 128], strides = [1, 1]} : vector<32x128xf32> to vector<16x128xf32>
    %18 = vector.extract_strided_slice %16 {offsets = [16, 0], sizes = [16, 128], strides = [1, 1]} : vector<32x128xf32> to vector<16x128xf32>
    %19 = arith.negf %18 : vector<16x128xf32>
    %20 = math.exp %19 : vector<16x128xf32>
    %cst_12 = arith.constant 1.000000e+00 : f32
    %21 = vector.broadcast %cst_12 : f32 to vector<16x128xf32>
    %22 = arith.addf %21, %20 : vector<16x128xf32>
    %23 = arith.divf %21, %22 : vector<16x128xf32>
    %24 = arith.mulf %17, %23 : vector<16x128xf32>
    %c0_13 = arith.constant 0 : index
    %c0_14 = arith.constant 0 : index
    %25 = vector.load %arg7[%c0_13, %c0_14] : memref<16x16xbf16, #tpu.memory_space<vmem>>, vector<16x16xbf16>
    %cst_15 = arith.constant dense<0.000000e+00> : vector<16x128xf32>
    %26 = tpu.matmul %25, %7, %cst_15 {dimension_numbers = #tpu.dot_dimension_numbers<[1], [0], [0], [1], [0, 0, 1, 1], [], []>} : vector<16x16xbf16>, vector<16x128xbf16>, vector<16x128xf32> -> vector<16x128xf32>
    %c0_16 = arith.constant 0 : index
    %c0_17 = arith.constant 0 : index
    %27 = vector.load %arg8[%c0_16, %c0_17] : memref<16x1xf32, #tpu.memory_space<vmem>>, vector<16x1xf32>
    %28 = vector.broadcast %27 : vector<16x1xf32> to vector<16x128xf32>
    %29 = arith.addf %26, %28 : vector<16x128xf32>
    %30 = arith.addf %24, %29 : vector<16x128xf32>
    %c0_18 = arith.constant 0 : index
    %c0_19 = arith.constant 0 : index
    %c0_20 = arith.constant 0 : index
    %31 = vector.load %arg9[%c0_18, %c0_19, %c0_20] : memref<1x16x128xf32, #tpu.memory_space<vmem>>, vector<1x16x128xf32>
    %32 = vector.shape_cast %31 : vector<1x16x128xf32> to vector<16x128xf32>
    %33 = vector.shape_cast %30 : vector<16x128xf32> to vector<1x16x128xf32>
    tpu.vector_store %arg9[%c0_18, %c0_19, %c0_20], %33 {strides = array<i32>} : memref<1x16x128xf32, #tpu.memory_space<vmem>>, vector<1x16x128xf32>,
    return
  }
  func.func @transform_0(%arg0: i32, %arg1: i32) -> (i32, i32, i32) {
    %c0_i32 = arith.constant 0 : i32
    %c0_i32_0 = arith.constant 0 : i32
    return %arg0, %c0_i32, %arg1 : i32, i32, i32
  }
  func.func @transform_1(%arg0: i32, %arg1: i32) -> (i32, i32, i32) {
    %c1_i32 = arith.constant 1 : i32
    %0 = arith.addi %arg1, %c1_i32 : i32
    %c1_i32_0 = arith.constant 1 : i32
    %1 = arith.muli %0, %c1_i32_0 : i32
    %c0_i32 = arith.constant 0 : i32
    %c0_i32_1 = arith.constant 0 : i32
    return %arg0, %c0_i32, %1 : i32, i32, i32
  }
  func.func @transform_2(%arg0: i32, %arg1: i32) -> (i32, i32) {
    %c0_i32 = arith.constant 0 : i32
    %c0_i32_0 = arith.constant 0 : i32
    %c0_i32_1 = arith.constant 0 : i32
    return %c0_i32, %c0_i32_0 : i32, i32
  }
  func.func @transform_3(%arg0: i32, %arg1: i32) -> (i32, i32) {
    %c0_i32 = arith.constant 0 : i32
    %c0_i32_0 = arith.constant 0 : i32
    %c0_i32_1 = arith.constant 0 : i32
    return %c0_i32, %c0_i32_0 : i32, i32
  }
  func.func @transform_4(%arg0: i32, %arg1: i32) -> (i32, i32) {
    %c0_i32 = arith.constant 0 : i32
    %c0_i32_0 = arith.constant 0 : i32
    %c0_i32_1 = arith.constant 0 : i32
    return %c0_i32, %c0_i32_0 : i32, i32
  }
  func.func @transform_5(%arg0: i32, %arg1: i32) -> (i32, i32) {
    %c0_i32 = arith.constant 0 : i32
    %c0_i32_0 = arith.constant 0 : i32
    %c0_i32_1 = arith.constant 0 : i32
    return %c0_i32, %c0_i32_0 : i32, i32
  }
  func.func @transform_6(%arg0: i32, %arg1: i32) -> (i32, i32) {
    %c0_i32 = arith.constant 0 : i32
    %c0_i32_0 = arith.constant 0 : i32
    %c0_i32_1 = arith.constant 0 : i32
    return %c0_i32, %c0_i32_0 : i32, i32
  }
  func.func @transform_7(%arg0: i32, %arg1: i32) -> (i32, i32, i32) {
    %c0_i32 = arith.constant 0 : i32
    %c0_i32_0 = arith.constant 0 : i32
    return %arg0, %c0_i32, %arg1 : i32, i32, i32
  }
}

</mosaic_0001>

<bundles_post_ra>
// kernel: tpu_custom_call.1
= control target key start
LH: loop header
LB: loop body
LE: loop exit
PB: predicated region body
PF: predicated region fallthrough
CT: control target
= control target key end

     0   :  { %12 = vsyncpa [#allocation5], 0  ;;  %s1256_s0 = inlined_call_operand.vmem [shape: bf16[2,16,256], index: 0, kind: input, shape index: {}]   ;;  %s1257_s1 = inlined_call_operand.vmem [shape: bf16[2,16,256], index: 1, kind: input, shape index: {}]   ;;  %s1258_s2 = inlined_call_operand.vmem [shape: bf16[16,48], index: 2, kind: input, shape index: {}]   ;;  %s1259_s3 = inlined_call_operand.vmem [shape: bf16[32,16], index: 3, kind: input, shape index: {}]   ;;  %s1260_s4 = inlined_call_operand.vmem [shape: f32[32,1], index: 4, kind: input, shape index: {}]   ;;  %s1261_s5 = inlined_call_operand.vmem [shape: bf16[16,16], index: 5, kind: input, shape index: {}]   ;;  %s1262_s6 = inlined_call_operand.vmem [shape: f32[16,1], index: 6, kind: input, shape index: {}]   ;;  %s1263_s7 = inlined_call_operand.hbm [shape: f32[2,16,128], index: 7, kind: output, shape index: {}]  }
   0x1   :  { %14 = vsyncpa [#allocation5 + $0x1], 0  ;;  %s1072_s24 = smov 0   ;;  %s1074_s25 = smov 0  }
   0x2   :  { %s1076_s26 = smov 0   ;;  %s1078_s27 = smov 0  }
   0x3   :  { %s1080_s28 = smov 0   ;;  %s1082_s29 = smov 0  }
   0x4 LB: > { %s797_s30 = sadd.s32 4294967295, %s1021_s29   ;;  %s798_s8 = sadd.s32 4294967294, %s1021_s29   ;;  %s1021_s29 = sphi %s1082_s29, %s20_s29   ;;  %s1017_s28 = sphi %s1080_s28, %s1271_s28   ;;  %s1013_s27 = sphi %s1078_s27, %s1270_s27   ;;  %s1009_s26 = sphi %s1076_s26, %s1269_s26   ;;  %s1005_s25 = sphi %s1074_s25, %s1268_s25   ;;  %s1001_s24 = sphi %s1072_s24, %s1267_s24  }
   0x5   : > { %s32_s9 = sadd.s32 1, %s1017_s28  ;;  %s41_s10 = sadd.s32 1, %s1009_s26 }
   0x6   : > { %p34_p0 = scmp.ge.s32.totalorder %s32_s9, 2  ;;  %p48_p1 = scmp.ne.s32.totalorder %s1009_s26, %s1005_s25 }
   0x7   : > { %p49_p2 = scmp.eq.s32.totalorder %s1021_s29, 0  ;;  %p215_p3 = scmp.eq.s32.totalorder %s797_s30, 1 }
   0x8   : > { %s1273_s9 = smov (%p34_p0, %s32_s9), 0  ;;  %p220_p6 = scmp.ne.s32.totalorder %s1005_s25, %s1001_s24 }
   0x9   : > { %p1111_p4 = por %p49_p2, %p48_p1  ;;  %p1115_p5 = por %p215_p3, %p48_p1 }
   0xa   : > { %s36_s13 = ssub.s32 %s1017_s28, %s1273_s9  ;;  %p221_p8 = scmp.eq.s32.totalorder %s798_s8, 1 }
   0xb   : > { %p39_p7 = scmp.eq.s32.totalorder %s36_s13, 0  ;;  %p800_p10 = scmp.ge.s32.totalorder %s1021_s29, 2 }
   0xc   : > { %p1126_p9 = por %p221_p8, %p220_p6 }
   0xd   : > { %s1124_s14 = scalar_select %p39_p7, %s1009_s26, %s41_s10  }
   0xe   : > { %252 = sbr.rel (%p800_p10) target bundleno = 35 (0x23), region = 36 }
  0x15   : > { %255 = sbr.rel (!%p1111_p4) target bundleno = 28 (0x1c), region = 40  ;;  %s257_s16 = sand.u32 (%p1111_p4), 1, %s1009_s26  }
  0x16   : > { %s830_s17 = sshll.u32 (%p1111_p4), %s1017_s28, 4  ;;  %s801_s18 = sshll.u32 (%p1111_p4), %s257_s16, 3 }
  0x17   : > { %s263_s21 = scalar_lea.vmem (%p1111_p4), %s1256_s0, %s830_s17  ;;  %s259_s22 = scalar_lea.vmem (%p1111_p4), [#allocation2], %s801_s18 }
  0x18   : > { %v279_v0 = vld [vmem:[%s263_s21] sm:$0xf] (%p1111_p4)  ;;  %v281_v1 = vld [vmem:[%s263_s21 + $0x8] sm:$0xf] (%p1111_p4) }
  0x19   : > { %280 = vst [vmem:[%s259_s22] sm:$0xf] (%p1111_p4), %v279_v0  ;;  %282 = vst [vmem:[%s259_s22 + $0x4] sm:$0xf] (%p1111_p4), %v281_v1 }
  0x1c PF: > { %309 = sbr.rel (!%p1111_p4) target bundleno = 35 (0x23), region = 81  ;;  %s311_s23 = sand.u32 (%p1111_p4), 1, %s1009_s26  }
  0x1d   : > { %s831_s30 = sshll.u32 (%p1111_p4), %s1017_s28, 4  ;;  %s804_s8 = sshll.u32 (%p1111_p4), %s311_s23, 3 }
  0x1e   : > { %s731_s16 = scalar_lea.vmem (%p1111_p4), %s1257_s1, %s831_s30  ;;  %s313_s17 = scalar_lea.vmem (%p1111_p4), [#allocation3], %s804_s8 }
  0x1f   : > { %v807_v2 = vld [vmem:[%s731_s16 + $0x4] sm:$0xf] (%p1111_p4)  ;;  %v808_v3 = vld [vmem:[%s731_s16 + $0xc] sm:$0xf] (%p1111_p4) }
  0x20   : > { %335 = vst [vmem:[%s313_s17] sm:$0xf] (%p1111_p4), %v807_v2  ;;  %337 = vst [vmem:[%s313_s17 + $0x4] sm:$0xf] (%p1111_p4), %v808_v3 }
  0x23 PF: > { %p809_p11 = scmp.ge.s32.totalorder %s1021_s29, 1  ;;  %p363_p12 = scmp.lt.s32.totalorder %s1021_s29, 3 }
  0x25   : > { %p364_p13 = pnand %p809_p11, %p363_p12 }
  0x26   : > { %s1150_s11 = sand.u32 (!%p364_p13), 1, %s1005_s25   ;;  %v1023_v4 = vmov (!%p364_p13), 0.0   ;;  %s1024_s21 = smov (!%p364_p13), 126   ;;  %vm1027_vm0 = vmmov (!%p364_p13), 0   ;;  %vm433_vm1 = vcmask (!%p364_p13), 1031168   ;;  %vm454_vm2 = vcmask (!%p364_p13), 31744  }
  0x27   : > { %367 = sbr.rel (%p364_p13) target bundleno = 766 (0x2fe), region = 122  ;;  %s810_s18 = sshll.u32 (!%p364_p13), %s1150_s11, 3  ;;  %842 = vmatprep.subr.bf16.mxu0 (!%p364_p13), %v1023_v4  ;;  %848 = vmatprep.mubr.msk.bf16.mxu0 (!%p364_p13), %vm1027_vm0, %v1023_v4  ;;  %v931_v18 = vld [vmem:[%s1258_s2] sm:$0xff] (!%p364_p13)   ;;  %vm460_vm3 = vcmask (!%p364_p13), 392192   ;;  %vm544_vm4 = vcmask (!%p364_p13), 130048   ;;  %v513_v20 = vld [vmem:[%s1260_s4 + $0x18] sm:$0xff] (!%p364_p13) }
  0x28   : > { %s372_s19 = scalar_lea.vmem (!%p364_p13), [#allocation2], %s810_s18  ;;  %s379_s20 = scalar_lea.vmem (!%p364_p13), [#allocation3], %s810_s18  ;;  %v932_v19 = vld [vmem:[%s1259_s3] sm:$0xff] (!%p364_p13)   ;;  %v512_v21 = vld [vmem:[%s1260_s4 + $0x10] sm:$0xff] (!%p364_p13)  ;;  %v1028_v22 = vmov (!%p364_p13), 0   ;;  %v511_v24 = vld [vmem:[%s1260_s4 + $0x8] sm:$0xff] (!%p364_p13) }
  0x29   : > { %v929_v5 = vld [vmem:[%s372_s19] sm:$0xff] (!%p364_p13)   ;;  %v1154_v6 = vld [vmem:[%s379_s20] sm:$0xff] (!%p364_p13)   ;;  %s1025_s22 = smov (!%p364_p13), 124   ;;  %s1026_s23 = smov (!%p364_p13), 4   ;;  %854 = vmatprep.mubr.msk.bf16.mxu1 (!%p364_p13), %vm544_vm4, %v932_v19  ;;  %928 = vset.pattern.permute.xlu1 (!%p364_p13), %v1028_v22 }
  0x2a   : > { %429 = vrot.lane.b32.xlu0 (!%p364_p13), %v929_v5, %s1024_s21  ;;  %435 = vrot.lane.b32.xlu1 (!%p364_p13), %v1154_v6, %s1025_s22  ;;  %v510_v23 = vld [vmem:[%s1260_s4] sm:$0xff] (!%p364_p13)  ;;  %v617_v26 = vld [vmem:[%s1262_s6 + $0x8] sm:$0xff] (!%p364_p13)  ;;  %s812_s20 = sshll.u32 (!%p364_p13), %s1150_s11, 4  ;;  %s682_s13 = scalar_lea.sflag (!%p364_p13), [#allocation5], %s1150_s11 }
  0x2b   : > { %927 = vset.pattern.permute.xlu0 (!%p364_p13), %v1028_v22  ;;  %v616_v25 = vld [vmem:[%s1262_s6] sm:$0xff] (!%p364_p13)  ;;  %v933_v32 = vld [vmem:[%s1259_s3 + $0x8] sm:$0xff] (!%p364_p13)   ;;  %s1029_s16 = smov (!%p364_p13), [#allocation4]  }
  0x2c   : > { %v934_v33 = vld [vmem:[%s1261_s5] sm:$0xff] (!%p364_p13)   ;;  %s947_s17 = sshll.u32 (!%p364_p13), %s1029_s16, 4  ;;  %s948_s17 = int_to_ptr.vmem [resolvable:$false] %s947_s17 }
  0x2d   : > { %s949_s18 = scalar_lea.vmem (!%p364_p13), %s948_s17, 512 }
  0x2e   : > { %431 = vrot.lane.b32.xlu0 %v1154_v6, %s1024_s21  ;;  %444 = vrot.lane.b32.xlu1 %v929_v5, %s1026_s23  ;;  %s411_s21 = scalar_lea.vmem [#allocation4], %s812_s20 }
  0x2f   : > { %s696_s22 = sshll.u32 %s411_s21, 4  ;;  %s1202_s22 = int_to_ptr.vmem [resolvable:$true] %s696_s22 }
  0x30   : > { %p950_p3 = scmp.lt.s32.totalorder %s1202_s22, %s948_s17 }
  0x32   : > { %446 = vrot.lane.b32.xlu0 %v1154_v6, %s1026_s23 }
  0x9c   : > { %v430_v7 = vpop.permute.xlu0 %429  ;;  %v436_v8 = vpop.permute.xlu1 %435 }
  0xa0   : > { %v432_v9 = vpop.permute.xlu0 %431  ;;  %v445_v11 = vpop.permute.xlu1 %444 }
  0xa1   : > { %450 = vrot.lane.b32.xlu0 %v432_v9, %s1026_s23  ;;  %v434_v10 = vsel %vm433_vm1, %v430_v7, %v432_v9 }
  0xa2   : > { %448 = vrot.lane.b32.xlu1 %v434_v10, %s1026_s23 }
  0xa4   : > { %v447_v12 = vpop.permute.xlu0 %446 }
  0xa5   : > { %v455_v13 = vsel %vm454_vm2, %v445_v11, %v447_v12  ;;  %526 = vperm.xlu0 %927, %v512_v21  }
  0xa6   : > { %452 = vrot.lane.b32.xlu1 %v436_v8, %s1026_s23  ;;  %843 = vmatpush3.bf16.msra.mxu0 %v455_v13  ;;  %s832_s23 = sshll.u32 %s1013_s27, 8  ;;  %s943_s27 = scalar_lea.vmem %s1202_s22, 256 }
  0xa7   : > { %844 = vmatprep.subr.bf16.mxu0 %v1023_v4  ;;  %s1207_s10 = scalar_lea.hbm %s1263_s7, %s832_s23  ;;  %p944_p0 = scmp.ne.s32.totalorder %s1202_s22, %s943_s27 }
  0xa8   : > { %p951_p4 = scmp.lt.s32.totalorder %s949_s18, %s943_s27 }
  0xa9   : > { %521 = vperm.xlu0 %927, %v511_v24   ;;  %p945_p1 = pnand %p944_p0, %p1115_p5 }
  0xaa   : > { %531 = vperm.xlu1 %928, %v513_v20   ;;  %p952_p6 = por %p951_p4, %p950_p3 }
  0xab   : > { %p946_p2 = pneg %p945_p1 }
  0xad   : > { %625 = vperm.xlu0 %927, %v617_v26   ;;  %p953_p7 = pnand %p952_p6, %p946_p2 }
  0xae   : > { %516 = vperm.xlu1 %928, %v510_v23  }
  0xb2   : > { %620 = vperm.xlu1 %928, %v616_v25  }
 0x113   : > { %v451_v14 = vpop.permute.xlu0 %450 }
 0x114   : > { %v449_v15 = vpop.permute.xlu1 %448 }
 0x115   : > { %v456_v16 = vsel %vm454_vm2, %v449_v15, %v451_v14 }
 0x116   : > { %845 = vmatpush3.bf16.msra.mxu0 %v456_v16 }
 0x117   : > { %846 = vmatprep.subr.bf16.mxu0 %v1023_v4 }
 0x118   : > { %v453_v17 = vpop.permute.xlu1 %452 }
 0x11a   : > { %847 = vmatpush3.bf16.msra.mxu0 %v453_v17 }
 0x11d   : > { %849 = vmatmul.mubr.msk.bf16.vlgmr.msra.gmra.mrb[0].mxu0 %vm460_vm3, %v931_v18 }
 0x124   : > { %v527_v34 = vpop.permute.xlu0 %526 }
 0x128   : > { %v522_v53 = vpop.permute.xlu0 %521 }
 0x129   : > { %v532_v38 = vpop.permute.xlu1 %531 }
 0x12c   : > { %v626_v61 = vpop.permute.xlu0 %625 }
 0x12d   : > { %v517_v52 = vpop.permute.xlu1 %516 }
 0x131   : > { %v621_v56 = vpop.permute.xlu1 %620 }
 0x1f0   : > { %v498_v27 = vpop.f32.mrb[0].mxu0 }
 0x1f1   : > { %v850_v28 = vpop.f32.mrb[1].mxu0 }
 0x1f2   : > { %v501_v29 = vpop.f32.mrb[2].mxu0 }
 0x1f3   : > { %v509_v30 = vpack.c.bf16 %v501_v29, %v498_v27  ;;  %v851_v31 = vpop.f32.mrb[3].mxu0 }
 0x1f5   : > { %852 = vmatprep.subr.bf16.mxu1 %v509_v30 }
 0x1f6   : > { %853 = vmatpush3.bf16.msra.mxu1 %v509_v30 }
 0x1f7   : > { %858 = vmatprep.subr.bf16.mxu1 %v1023_v4 }
 0x1f9   : > { %855 = vmatmul.mubr.msk.bf16.vlgmr.msra.gmra.mrb[0].mxu1 %vm544_vm4, %v933_v32 }
 0x1fa   : > { %859 = vmatpush3.bf16.msra.mxu1 %v1154_v6  ;;  %860 = vmatprep.mubr.msk.bf16.mxu1 %vm1027_vm0, %v1023_v4 }
 0x201   : > { %861 = vmatmul.mubr.msk.bf16.vlgmr.msra.gmra.mrb[4].mxu1 %vm544_vm4, %v934_v33 }
 0x2cc   : > { %v856_v35 = vpop.f32.mrb[0].mxu1 }
 0x2cd   : > { %v594_v36 = vadd.f32 %v856_v35, %v527_v34  ;;  %v585_v37 = vpop.f32.mrb[1].mxu1 }
 0x2ce   : > { %v857_v39 = vpop.f32.mrb[2].mxu1  ;;  %v586_v54 = vadd.f32 %v585_v37, %v517_v52 }
 0x2cf   : > { %v821_v40 = vmul.f32 -1.442695, %v594_v36  ;;  %v597_v41 = vadd.f32 %v857_v39, %v532_v38  ;;  %v588_v42 = vpop.f32.mrb[3].mxu1 }
 0x2d0   : > { %v589_v58 = vadd.f32 %v588_v42, %v522_v53 }
 0x2d1   : > { %935 = vpow2.f32 %v821_v40  ;;  %v822_v43 = vmul.f32 -1.442695, %v597_v41 }
 0x2d3   : > { %937 = vpow2.f32 %v822_v43 }
 0x2d4   : > { %v670_v44 = vpop.f32.mrb[4].mxu1 }
 0x2d5   : > { %v862_v45 = vpop.f32.mrb[5].mxu1  ;;  %v671_v59 = vadd.f32 %v670_v44, %v621_v56 }
 0x2d6   : > { %v673_v46 = vpop.f32.mrb[6].mxu1 }
 0x2d7   : > { %v863_v47 = vpop.f32.mrb[7].mxu1  ;;  %v674_v0 = vadd.f32 %v673_v46, %v626_v61 }
 0x2db   : > { %v936_v48 = vpop.eup %935 }
 0x2dc   : > { %v606_v49 = vadd.f32 1.0, %v936_v48 }
 0x2dd   : > { %v938_v50 = vpop.eup %937 }
 0x2de   : > { %939 = vrcp.f32 %v606_v49  ;;  %v607_v51 = vadd.f32 1.0, %v938_v50 }
 0x2e0   : > { %941 = vrcp.f32 %v607_v51 }
 0x2e8   : > { %v940_v55 = vpop.eup %939 }
 0x2e9   : > { %v612_v57 = vmul.f32 %v940_v55, %v586_v54 }
 0x2ea   : > { %v942_v60 = vpop.eup %941 }
 0x2eb   : > { %v613_v62 = vmul.f32 %v942_v60, %v589_v58  ;;  %v677_v63 = vadd.f32 %v671_v59, %v612_v57 }
 0x2ed   : > { %679 = vst [vmem:[%s411_s21] sm:$0xff] %v677_v63  ;;  %v678_v1 = vadd.f32 %v674_v0, %v613_v62 }
 0x2ef   : > { %680 = vst [vmem:[%s411_s21 + $0x8] sm:$0xff] %v678_v1 }
 0x2f0   : > { %956 = shalt.err (!%p953_p7)
}
 0x2f1   : > { %s957_s19 = scalar_lea.hbm %s1207_s10, 256  ;;  %s961_s23 = scalar_lea.hbm %s1263_s7, 512 }
 0x2f2   : > { %p958_p8 = scmp.ne.s32.totalorder %s1207_s10, %s957_s19  ;;  %p962_p13 = scmp.lt.u32.totalorder %s1207_s10, %s1263_s7 }
 0x2f3   : > { %p963_p0 = scmp.lt.u32.totalorder %s961_s23, %s957_s19  ;;  %p965_p2 = scmp.lt.u32.totalorder %s957_s19, %s1207_s10 }
 0x2f4   : > { %p959_p11 = pnand %p958_p8, %p1115_p5 }
 0x2f5   : > { %p964_p1 = por %p963_p0, %p962_p13 }
 0x2f6   : > { %p960_p12 = pneg %p959_p11 }
 0x2f7   : > { %p966_p3 = por %p965_p2, %p964_p1 }
 0x2f9   : > { %p967_p4 = pnand %p966_p3, %p960_p12 }
 0x2fb   : > { %970 = shalt.err (!%p967_p4)
}
 0x2fc   : > { %s1030_s27 = smov 128   ;;  %s1031_s16 = smov 8  }
 0x2fd   : > { %864 = dma.vmem_to_hbm [thread:$0]  (%p1115_p5), %s1202_s22, 256, %s1207_s10, %s682_s13, %s1030_s27, %s1030_s27, %s1031_s16  }
 0x2fe PF: > { %s711_s17 = sand.u32 1, %s1001_s24   ;;  %p867_p6 = pnand %p800_p10, %p1126_p9 }
 0x2ff   : > { %s712_s18 = scalar_lea.sflag [#allocation5], %s711_s17 }
 0x300   : > { %996 = dma.done.wait (!%p867_p6), %s712_s18, 256  }
 0x301   : > { %998 = vsyncadd (!%p867_p6), %s712_s18, 4294967040  ;;  %s20_s29 = sadd.s32 1, %s1021_s29   ;;  %s1267_s24 = smov %s1005_s25 }
 0x302   : > { %p17_p7 = scmp.ge.s32.totalorder %s20_s29, 4   ;;  %s1268_s25 = smov %s1009_s26 }
 0x303   : > { %s1269_s26 = smov %s1124_s14  ;;  %s1270_s27 = smov %s1017_s28 }
 0x304   : > { %s1271_s28 = smov %s1273_s9  ;;  %19 = sbr.rel (!%p17_p7) target bundleno = 4 (0x4), region = 178 }
 0x30b   :  { %717 = vsyncpa [#allocation5], 1 }
 0x30c   :  { %719 = vsyncpa [#allocation5 + $0x1], 1 }

</bundles_post_ra>
